<compile_context>
chip_gen: v6e
topology: v6e:2x2x1
jax: 0.10.0
libtpu: 0.0.40
codegen_flags: <defaults>
</compile_context>

<pallas_src>
import jax
import jax.numpy as jnp
from jax.experimental import pallas as pl
from jax.experimental.pallas import tpu as pltpu


def _round_up(x, m):
    return -(-x // m) * m


def _tpe_kernel(x_ref, tp_ref, o_ref):
    """x_ref, o_ref: (blk_s, B, blk_e); tp_ref: (tpB, blk_s, blk_e)."""
    tp_batch = tp_ref.shape[0]
    n_batch = x_ref.shape[1]
    out_dtype = o_ref.dtype
    for b in range(n_batch):                       # static unroll over batch
        tb = b if tp_batch > 1 else 0              # broadcast if tpB == 1
        o_ref[:, b, :] = (x_ref[:, b, :].astype(out_dtype)
                          + tp_ref[tb].astype(out_dtype))


def _tpe_kernel_dense(x_ref, tp_ref, o_ref):
    """Lane-dense 2-D add used on the batch == 1 fast path."""
    o_ref[...] = (x_ref[...].astype(o_ref.dtype)
                  + tp_ref[...].astype(o_ref.dtype))


def _pick_tiles(S, E, bytes_per_cell, budget=8 << 20):
    """Pick (blk_s, blk_e) so one grid step's operands stay under `budget`.

    bytes_per_cell: VMEM bytes needed per (seq row) x (embed col), summed over
    all operands and including any sublane padding of the batch axis.
    """
    def step_cost(bs, be):
        return bs * _round_up(be, 128) * bytes_per_cell

    blk_e = E
    while blk_e > 128 and step_cost(8, blk_e) > budget:
        blk_e = max(128, (blk_e // 2) // 128 * 128)

    blk_s = budget // max(1, step_cost(1, blk_e))
    if S >= 8:
        blk_s = max(8, min(S, blk_s) // 8 * 8)     # sublane-aligned seq tile
    else:
        blk_s = S                                  # tiny input: full block
    # Prefer >= 2 grid steps on big-enough inputs so both v7x cores get work.
    if blk_e == E and blk_s >= S and S >= 16:
        blk_s = max(8, (S // 2) // 8 * 8)
    return blk_s, blk_e


def time_positional_encoding(x, time_position, *, donate_x=False):
    """out[s, b, e] = x[s, b, e] + time_position[b, s, e].

    x: (S, B, E) seq-major activations.
    time_position: (B, S, E) batch-major positions (PyTorch layout).  A leading
    batch of 1, or a 2-D (S, E) array, broadcasts over the batch.
    """
    S, B, E = x.shape
    tp = time_position
    if tp.ndim == 2:
        tp = tp[None]
    if tp.ndim != 3 or tp.shape[1:] != (S, E) or tp.shape[0] not in (1, B):
        raise ValueError(
            f"time_position shape {time_position.shape} is not "
            f"broadcast-compatible with x shape {x.shape}")
    tp_batch = tp.shape[0]

    out_dtype = jnp.promote_types(x.dtype, tp.dtype)
    x_isz = jnp.dtype(x.dtype).itemsize
    tp_isz = jnp.dtype(tp.dtype).itemsize
    o_isz = jnp.dtype(out_dtype).itemsize

    cost = pl.CostEstimate(
        flops=S * B * E,
        transcendentals=0,
        bytes_accessed=x.size * x_isz + tp.size * tp_isz + S * B * E * o_isz,
    )
    aliases = {0: 0} if (donate_x and out_dtype == x.dtype) else {}

    if B == 1:
        # Lane-dense fast path: fold away the unit batch dim entirely.
        x2 = x.reshape(S, E)
        tp2 = tp.reshape(S, E)
        bytes_per_cell = x_isz + tp_isz + o_isz
        blk_s, blk_e = _pick_tiles(S, E, bytes_per_cell)
        step_bytes = blk_s * _round_up(blk_e, 128) * bytes_per_cell
        grid = (pl.cdiv(S, blk_s), pl.cdiv(E, blk_e))
        out2 = pl.pallas_call(
            _tpe_kernel_dense,
            out_shape=jax.ShapeDtypeStruct((S, E), out_dtype),
            grid_spec=pl.GridSpec(
                grid=grid,
                in_specs=[pl.BlockSpec((blk_s, blk_e), lambda i, j: (i, j)),
                          pl.BlockSpec((blk_s, blk_e), lambda i, j: (i, j))],
                out_specs=pl.BlockSpec((blk_s, blk_e), lambda i, j: (i, j)),
            ),
            compiler_params=pltpu.CompilerParams(
                dimension_semantics=("parallel", "parallel"),
                vmem_limit_bytes=int(min(max(3 * step_bytes, 20 << 20), 40 << 20)),
            ),
            cost_estimate=cost,
            input_output_aliases=aliases,
        )(x2, tp2)
        return out2.reshape(S, B, E)

    # General path: x / out stay seq-major, time_position stays batch-major;
    # the permute is resolved in-kernel with per-batch slices (no HBM transpose).
    b_pad = _round_up(B, 8)                        # sublane padding of x/out tiles
    bytes_per_cell = b_pad * (x_isz + o_isz) + tp_batch * tp_isz
    blk_s, blk_e = _pick_tiles(S, E, bytes_per_cell)
    step_bytes = blk_s * _round_up(blk_e, 128) * bytes_per_cell
    grid = (pl.cdiv(S, blk_s), pl.cdiv(E, blk_e))

    out = pl.pallas_call(
        _tpe_kernel,
        out_shape=jax.ShapeDtypeStruct((S, B, E), out_dtype),
        grid_spec=pl.GridSpec(
            grid=grid,
            in_specs=[
                pl.BlockSpec((blk_s, B, blk_e), lambda i, j: (i, 0, j)),
                pl.BlockSpec((tp_batch, blk_s, blk_e), lambda i, j: (0, i, j)),
            ],
            out_specs=pl.BlockSpec((blk_s, B, blk_e), lambda i, j: (i, 0, j)),
        ),
        compiler_params=pltpu.CompilerParams(
            dimension_semantics=("parallel", "parallel"),
            vmem_limit_bytes=int(min(max(3 * step_bytes, 20 << 20), 40 << 20)),
        ),
        cost_estimate=cost,
        input_output_aliases=aliases,
    )(x, tp)
    return out


if __name__ == "__main__":
    key = jax.random.PRNGKey(0)
    k1, k2, k3, k4 = jax.random.split(key, 4)

    def ref_fn(x, tp):
        # Pure-JAX reference of the PyTorch forward (permute -> add -> permute).
        return jnp.transpose(jnp.transpose(x, (1, 0, 2)) + tp, (1, 0, 2))

    # Case 1: seq=8, batch=2, embed=32 (PyTorch time_position layout (B, S, E)).
    S, B, E = 8, 2, 32
    x = jax.random.normal(k1, (S, B, E), dtype=jnp.float32)
    tp = jax.random.normal(k2, (B, S, E), dtype=jnp.float32)
    out = jax.block_until_ready(time_positional_encoding(x, tp))
    assert out.shape == (S, B, E)
    assert jnp.allclose(out, ref_fn(x, tp), atol=1e-6), "mismatch (case 1)"

    # Case 2: ragged seq length (remainder block) on the general path.
    S2, B2, E2 = 20, 2, 32
    x2 = jax.random.normal(k3, (S2, B2, E2), dtype=jnp.float32)
    tp2 = jax.random.normal(k4, (B2, S2, E2), dtype=jnp.float32)
    out2 = jax.block_until_ready(time_positional_encoding(x2, tp2))
    assert jnp.allclose(out2, ref_fn(x2, tp2), atol=1e-6), "mismatch (case 2)"

    # Case 3: batch=1 lane-dense fast path.
    x3, tp3 = x[:, :1, :], tp[:1]
    out3 = jax.block_until_ready(time_positional_encoding(x3, tp3))
    assert jnp.allclose(out3, ref_fn(x3, tp3), atol=1e-6), "mismatch (case 3)"

    print("KERNEL_OK")
</pallas_src>

<mosaic_0001>
module attributes {stable_mosaic.version = 11 : i64} {
  func.func @_tpe_kernel(%arg0: i32, %arg1: i32, %arg2: memref<8x2x32xf32, #tpu.memory_space<vmem>>, %arg3: memref<2x8x32xf32, #tpu.memory_space<vmem>>, %arg4: memref<8x2x32xf32, #tpu.memory_space<vmem>>) attributes {dimension_semantics = [#tpu.dimension_semantics<parallel>, #tpu.dimension_semantics<parallel>], iteration_bounds = array<i64: 1, 1>, scalar_prefetch = 0 : i64, scratch_operands = 0 : i64, tpu.core_type = #tpu.core_type<tc>, window_params = [{transform_indices = @transform_0, window_bounds = array<i64: 8, 2, 32>}, {transform_indices = @transform_1, window_bounds = array<i64: 2, 8, 32>}, {transform_indices = @transform_2, window_bounds = array<i64: 8, 2, 32>}]} {
    %c0 = arith.constant 0 : index
    %c0_0 = arith.constant 0 : index
    %c0_1 = arith.constant 0 : index
    %0 = vector.load %arg2[%c0, %c0_0, %c0_1] : memref<8x2x32xf32, #tpu.memory_space<vmem>>, vector<8x1x32xf32>
    %1 = vector.shape_cast %0 : vector<8x1x32xf32> to vector<8x32xf32>
    %c0_2 = arith.constant 0 : index
    %c0_3 = arith.constant 0 : index
    %c0_4 = arith.constant 0 : index
    %2 = vector.load %arg3[%c0_2, %c0_3, %c0_4] : memref<2x8x32xf32, #tpu.memory_space<vmem>>, vector<1x8x32xf32>
    %3 = vector.shape_cast %2 : vector<1x8x32xf32> to vector<8x32xf32>
    %4 = arith.addf %1, %3 : vector<8x32xf32>
    %c0_5 = arith.constant 0 : index
    %c0_6 = arith.constant 0 : index
    %c0_7 = arith.constant 0 : index
    %5 = vector.load %arg4[%c0_5, %c0_6, %c0_7] : memref<8x2x32xf32, #tpu.memory_space<vmem>>, vector<8x1x32xf32>
    %6 = vector.shape_cast %5 : vector<8x1x32xf32> to vector<8x32xf32>
    %7 = vector.shape_cast %4 : vector<8x32xf32> to vector<8x1x32xf32>
    tpu.vector_store %arg4[%c0_5, %c0_6, %c0_7], %7 {strides = array<i32>} : memref<8x2x32xf32, #tpu.memory_space<vmem>>, vector<8x1x32xf32>,
    %c0_8 = arith.constant 0 : index
    %c1 = arith.constant 1 : index
    %c0_9 = arith.constant 0 : index
    %8 = vector.load %arg2[%c0_8, %c1, %c0_9] : memref<8x2x32xf32, #tpu.memory_space<vmem>>, vector<8x1x32xf32>
    %9 = vector.shape_cast %8 : vector<8x1x32xf32> to vector<8x32xf32>
    %c1_10 = arith.constant 1 : index
    %c0_11 = arith.constant 0 : index
    %c0_12 = arith.constant 0 : index
    %10 = vector.load %arg3[%c1_10, %c0_11, %c0_12] : memref<2x8x32xf32, #tpu.memory_space<vmem>>, vector<1x8x32xf32>
    %11 = vector.shape_cast %10 : vector<1x8x32xf32> to vector<8x32xf32>
    %12 = arith.addf %9, %11 : vector<8x32xf32>
    %c0_13 = arith.constant 0 : index
    %c1_14 = arith.constant 1 : index
    %c0_15 = arith.constant 0 : index
    %13 = vector.load %arg4[%c0_13, %c1_14, %c0_15] : memref<8x2x32xf32, #tpu.memory_space<vmem>>, vector<8x1x32xf32>
    %14 = vector.shape_cast %13 : vector<8x1x32xf32> to vector<8x32xf32>
    %15 = vector.shape_cast %12 : vector<8x32xf32> to vector<8x1x32xf32>
    tpu.vector_store %arg4[%c0_13, %c1_14, %c0_15], %15 {strides = array<i32>} : memref<8x2x32xf32, #tpu.memory_space<vmem>>, vector<8x1x32xf32>,
    return
  }
  func.func @transform_0(%arg0: i32, %arg1: i32) -> (i32, i32, i32) {
    %c0_i32 = arith.constant 0 : i32
    %c0_i32_0 = arith.constant 0 : i32
    return %arg0, %c0_i32, %arg1 : i32, i32, i32
  }
  func.func @transform_1(%arg0: i32, %arg1: i32) -> (i32, i32, i32) {
    %c0_i32 = arith.constant 0 : i32
    %c0_i32_0 = arith.constant 0 : i32
    return %c0_i32, %arg0, %arg1 : i32, i32, i32
  }
  func.func @transform_2(%arg0: i32, %arg1: i32) -> (i32, i32, i32) {
    %c0_i32 = arith.constant 0 : i32
    %c0_i32_0 = arith.constant 0 : i32
    return %arg0, %c0_i32, %arg1 : i32, i32, i32
  }
}

</mosaic_0001>

<bundles_post_ra>
// kernel: tpu_custom_call.1
= control target key start
LH: loop header
LB: loop body
LE: loop exit
PB: predicated region body
PF: predicated region fallthrough
CT: control target
= control target key end

     0   :  { %7 = vsyncpa [#allocation3], 0  ;;  %s268_s0 = inlined_call_operand.hbm [shape: f32[8,2,32], index: 0, kind: input, shape index: {}]   ;;  %s269_s1 = inlined_call_operand.hbm [shape: f32[2,8,32], index: 1, kind: input, shape index: {}]   ;;  %s270_s2 = inlined_call_operand.hbm [shape: f32[8,2,32], index: 2, kind: output, shape index: {}]  }
   0x1   :  { %8 = vsyncpa [#allocation6], 0 }
   0x2   :  { %9 = vsyncpa [#allocation4], 0  ;;  %s215_s9 = smov [#allocation2]  }
   0x3   :  { %s15_s10 = sshll.u32 %s215_s9, 4  ;;  %s16_s10 = int_to_ptr.vmem [resolvable:$true] %s15_s10 }
   0x4   :  { %s157_s11 = scalar_lea.vmem %s16_s10, 256  ;;  %p162_p1 = scmp.lt.s32.totalorder %s16_s10, %s16_s10 }
   0x5   :  { %p158_p0 = scmp.ne.s32.totalorder %s16_s10, %s157_s11  ;;  %p163_p2 = scmp.lt.s32.totalorder %s157_s11, %s157_s11 }
   0x7   :  { %p164_p3 = por %p163_p2, %p162_p1 }
   0x9   :  { %p165_p4 = pnand %p164_p3, %p158_p0 }
   0xb   :  { %168 = shalt.err (!%p165_p4)
}
   0xc   :  { %s216_s12 = smov 32   ;;  %s217_s13 = smov 2  }
   0xd   :  { %21 = dma.hbm_to_vmem [thread:$0]  %s268_s0, 256, %s16_s10, [#allocation3], %s216_s12, %s216_s12, %s217_s13  }
   0xe   :  { %s218_s16 = smov [#allocation5]  }
   0xf   :  { %s27_s17 = sshll.u32 %s218_s16, 4  ;;  %s28_s17 = int_to_ptr.vmem [resolvable:$true] %s27_s17 }
  0x10   :  { %s177_s18 = scalar_lea.vmem %s28_s17, 256  ;;  %p182_p6 = scmp.lt.s32.totalorder %s28_s17, %s28_s17 }
  0x11   :  { %p178_p5 = scmp.ne.s32.totalorder %s28_s17, %s177_s18  ;;  %p183_p7 = scmp.lt.s32.totalorder %s177_s18, %s177_s18 }
  0x13   :  { %p184_p8 = por %p183_p7, %p182_p6 }
  0x15   :  { %p185_p9 = pnand %p184_p8, %p178_p5 }
  0x17   :  { %188 = shalt.err (!%p185_p9)
}
  0x18   :  { %s219_s19 = smov 128   ;;  %s220_s20 = smov 8  }
  0x19   :  { %33 = dma.hbm_to_vmem [thread:$0]  %s269_s1, 256, %s28_s17, [#allocation6], %s219_s19, %s219_s19, %s220_s20  }
  0x1a   :  { %209 = dma.done.wait [#allocation3], 256  }
  0x1b   :  { %210 = vsyncadd [#allocation3], 4294967040 }
  0x1c   :  { %211 = dma.done.wait [#allocation6], 256  }
  0x1d   :  { %212 = vsyncadd [#allocation6], 4294967040  ;;  %vm73_vm0 = vcmask 253952   ;;  %v40_v0 = vld [vmem:[#allocation2] sm:$0x1]  ;;  %v48_v1 = vld [vmem:[#allocation5] sm:$0xff] }
  0x1e   :  { %v41_v2 = vld [vmem:[#allocation2 + $0x2] sm:$0x1]  ;;  %v65_v3 = vadd.f32 %v48_v1, %v40_v0  ;;  %v50_v4 = vrot.slane %v48_v1, 1  ;;  %v42_v5 = vld [vmem:[#allocation2 + $0x4] sm:$0x1]  ;;  %v51_v6 = vrot.slane %v48_v1, 2 }
  0x1f   :  { %v43_v7 = vld [vmem:[#allocation2 + $0x6] sm:$0x1]  ;;  %v52_v8 = vrot.slane %v48_v1, 3  ;;  %v44_v9 = vld [vmem:[#allocation2 + $0x8] sm:$0x1]  ;;  %v53_v10 = vrot.slane %v48_v1, 4 }
  0x20   :  { %v45_v11 = vld [vmem:[#allocation2 + $0xa] sm:$0x1]  ;;  %74 = vst.msk [vmem:[#allocation7] sm:$0x1] %vm73_vm0, %v65_v3  ;;  %v66_v12 = vadd.f32 %v50_v4, %v41_v2  ;;  %v67_v13 = vadd.f32 %v51_v6, %v42_v5  ;;  %v54_v14 = vrot.slane %v48_v1, 5  ;;  %v55_v16 = vrot.slane %v48_v1, 6 }
  0x21   :  { %v46_v15 = vld [vmem:[#allocation2 + $0xc] sm:$0x1]  ;;  %v47_v17 = vld [vmem:[#allocation2 + $0xe] sm:$0x1]  ;;  %v68_v18 = vadd.f32 %v52_v8, %v43_v7  ;;  %v69_v19 = vadd.f32 %v53_v10, %v44_v9  ;;  %v56_v20 = vrot.slane %v48_v1, 7  ;;  %v91_v22 = vld [vmem:[#allocation5 + $0x8] sm:$0xff] }
  0x22   :  { %v82_v21 = vld [vmem:[#allocation2 + $0x1] sm:$0x1]  ;;  %v83_v23 = vld [vmem:[#allocation2 + $0x3] sm:$0x1]  ;;  %75 = vst.msk [vmem:[#allocation7 + $0x2] sm:$0x1] %vm73_vm0, %v66_v12  ;;  %v70_v24 = vadd.f32 %v54_v14, %v45_v11  ;;  %v71_v25 = vadd.f32 %v55_v16, %v46_v15 }
  0x23   :  { %76 = vst.msk [vmem:[#allocation7 + $0x4] sm:$0x1] %vm73_vm0, %v67_v13  ;;  %v108_v26 = vadd.f32 %v91_v22, %v82_v21  ;;  %v93_v27 = vrot.slane %v91_v22, 1  ;;  %v84_v28 = vld [vmem:[#allocation2 + $0x5] sm:$0x1]  ;;  %v72_v30 = vadd.f32 %v56_v20, %v47_v17  ;;  %v94_v31 = vrot.slane %v91_v22, 2 }
  0x24   :  { %v85_v29 = vld [vmem:[#allocation2 + $0x7] sm:$0x1]  ;;  %77 = vst.msk [vmem:[#allocation7 + $0x6] sm:$0x1] %vm73_vm0, %v68_v18  ;;  %78 = vst.msk [vmem:[#allocation7 + $0x8] sm:$0x1] %vm73_vm0, %v69_v19 }
  0x25   :  { %v95_v32 = vrot.slane %v91_v22, 3  ;;  %v86_v33 = vld [vmem:[#allocation2 + $0x9] sm:$0x1]  ;;  %v96_v34 = vrot.slane %v91_v22, 4  ;;  %s221_s0 = smov [#allocation7]   ;;  %v109_v35 = vadd.f32 %v93_v27, %v83_v23  ;;  %v97_v37 = vrot.slane %v91_v22, 5 }
  0x26   :  { %s129_s1 = sshll.u32 %s221_s0, 4  ;;  %79 = vst.msk [vmem:[#allocation7 + $0xa] sm:$0x1] %vm73_vm0, %v70_v24  ;;  %80 = vst.msk [vmem:[#allocation7 + $0xc] sm:$0x1] %vm73_vm0, %v71_v25  ;;  %v98_v39 = vrot.slane %v91_v22, 6  ;;  %v110_v40 = vadd.f32 %v94_v31, %v84_v28  ;;  %s130_s1 = int_to_ptr.vmem [resolvable:$true] %s129_s1 }
  0x27   :  { %116 = vst.msk [vmem:[#allocation7 + $0x1] sm:$0x1] %vm73_vm0, %v108_v26  ;;  %v87_v36 = vld [vmem:[#allocation2 + $0xb] sm:$0x1]  ;;  %v88_v38 = vld [vmem:[#allocation2 + $0xd] sm:$0x1]  ;;  %v111_v41 = vadd.f32 %v95_v32, %v85_v29  ;;  %v112_v42 = vadd.f32 %v96_v34, %v86_v33  ;;  %p194_p11 = scmp.lt.s32.totalorder %s130_s1, %s130_s1 }
  0x28   :  { %81 = vst.msk [vmem:[#allocation7 + $0xe] sm:$0x1] %vm73_vm0, %v72_v30  ;;  %v89_v43 = vld [vmem:[#allocation2 + $0xf] sm:$0x1]  ;;  %v99_v44 = vrot.slane %v91_v22, 7  ;;  %v113_v45 = vadd.f32 %v97_v37, %v87_v36  ;;  %v114_v46 = vadd.f32 %v98_v39, %v88_v38  ;;  %s189_s23 = scalar_lea.vmem %s130_s1, 256 }
  0x29   :  { %117 = vst.msk [vmem:[#allocation7 + $0x3] sm:$0x1] %vm73_vm0, %v109_v35  ;;  %118 = vst.msk [vmem:[#allocation7 + $0x5] sm:$0x1] %vm73_vm0, %v110_v40  ;;  %p190_p10 = scmp.ne.s32.totalorder %s130_s1, %s189_s23  ;;  %p195_p12 = scmp.lt.s32.totalorder %s189_s23, %s189_s23 }
  0x2a   :  { %119 = vst.msk [vmem:[#allocation7 + $0x7] sm:$0x1] %vm73_vm0, %v111_v41  ;;  %120 = vst.msk [vmem:[#allocation7 + $0x9] sm:$0x1] %vm73_vm0, %v112_v42  ;;  %v115_v47 = vadd.f32 %v99_v44, %v89_v43 }
  0x2b   :  { %121 = vst.msk [vmem:[#allocation7 + $0xb] sm:$0x1] %vm73_vm0, %v113_v45  ;;  %122 = vst.msk [vmem:[#allocation7 + $0xd] sm:$0x1] %vm73_vm0, %v114_v46  ;;  %p196_p13 = por %p195_p12, %p194_p11 }
  0x2c   :  { %123 = vst.msk [vmem:[#allocation7 + $0xf] sm:$0x1] %vm73_vm0, %v115_v47 }
  0x2d   :  { %p197_p0 = pnand %p196_p13, %p190_p10 }
  0x2f   :  { %200 = shalt.err (!%p197_p0)
}
  0x30   :  { %135 = dma.vmem_to_hbm [thread:$0]  %s130_s1, 256, %s270_s2, [#allocation4], %s216_s12, %s216_s12, %s217_s13  }
  0x31   :  { %213 = dma.done.wait [#allocation4], 256  }
  0x32   :  { %214 = vsyncadd [#allocation4], 4294967040 }
  0x33   :  { %139 = vsyncpa [#allocation3], 1 }
  0x34   :  { %140 = vsyncpa [#allocation6], 1 }
  0x35   :  { %141 = vsyncpa [#allocation4], 1 }

</bundles_post_ra>
